<compile_context>
chip_gen: v7x
topology: tpu7x:2x2x1
jax: 0.10.0
libtpu: 0.0.40
codegen_flags: <defaults>
</compile_context>

<pallas_src>
import jax
import jax.numpy as jnp
from jax.experimental import pallas as pl
from jax.experimental.pallas import tpu as pltpu


# ----------------------------------------------------------------------------
# Fused Pallas kernel: softmax(relu(x @ W1 + b1) @ W2 + b2)
# ----------------------------------------------------------------------------

def _mlp_kernel(x_ref, w1_ref, b1_ref, w2_ref, b2_ref, out_ref):
    # Hidden layer GEMM: bf16 operands, f32 MXU accumulation.
    h = jnp.dot(x_ref[...], w1_ref[...], preferred_element_type=jnp.float32)
    h = h + b1_ref[...]
    # Dropout (eval mode) == identity; module applies it before the ReLU.
    h = jnp.maximum(h, 0.0)

    # Output layer GEMM (cast hidden activation back to bf16 for the MXU).
    logits = jnp.dot(h.astype(w2_ref.dtype), w2_ref[...],
                     preferred_element_type=jnp.float32) + b2_ref[...]

    # Numerically stable softmax over dim=1, f32 epilogue.
    m = jnp.max(logits, axis=1, keepdims=True)
    e = jnp.exp(logits - m)
    out_ref[...] = (e / jnp.sum(e, axis=1, keepdims=True)).astype(out_ref.dtype)


# ----------------------------------------------------------------------------
# Wrapper: flatten (PyTorch .view semantics), pad/tile batch, call the kernel.
# ----------------------------------------------------------------------------

def mlp_forward(params, x):
    # x.view(-1, x.shape[1] * x.shape[-2] * x.shape[-1])
    dim_in = x.shape[1] * x.shape[-2] * x.shape[-1]
    xf = x.reshape(-1, dim_in).astype(jnp.float32)
    M = xf.shape[0]

    w1, b1 = params["w1"], params["b1"]          # [D_in, D_h] bf16, [1, D_h] f32
    w2, b2 = params["w2"], params["b2"]          # [D_h, D_out] bf16, [1, D_out] f32
    d_h = w1.shape[1]
    d_out = w2.shape[1]

    # Batch (M) tiling: multiple of 8 sublanes; cap the tile so larger batches
    # pipeline over a grid instead of one huge block.
    TM = 256 if M >= 256 else max(8, ((M + 7) // 8) * 8)
    Mp = ((M + TM - 1) // TM) * TM
    if Mp != M:
        xf = jnp.pad(xf, ((0, Mp - M), (0, 0)))
    x_bf = xf.astype(jnp.bfloat16)               # halve HBM->VMEM bytes

    out = pl.pallas_call(
        _mlp_kernel,
        out_shape=jax.ShapeDtypeStruct((Mp, d_out), jnp.float32),
        grid=(Mp // TM,),
        in_specs=[
            pl.BlockSpec((TM, dim_in), lambda i: (i, 0)),    # x tile (pipelined)
            pl.BlockSpec((dim_in, d_h), lambda i: (0, 0)),   # W1 resident
            pl.BlockSpec((1, d_h), lambda i: (0, 0)),        # b1 resident
            pl.BlockSpec((d_h, d_out), lambda i: (0, 0)),    # W2 resident
            pl.BlockSpec((1, d_out), lambda i: (0, 0)),      # b2 resident
        ],
        out_specs=pl.BlockSpec((TM, d_out), lambda i: (i, 0)),
        compiler_params=pltpu.CompilerParams(
            dimension_semantics=("parallel",)),
    )(x_bf, w1, b1, w2, b2)

    return out[:M]


# ----------------------------------------------------------------------------
# Pure-JAX reference (same bf16 rounding points) for a tight correctness check.
# ----------------------------------------------------------------------------

def mlp_reference(params, x):
    dim_in = x.shape[1] * x.shape[-2] * x.shape[-1]
    xf = x.reshape(-1, dim_in).astype(jnp.float32)
    x_bf = xf.astype(jnp.bfloat16).astype(jnp.float32)
    w1 = params["w1"].astype(jnp.float32)
    w2 = params["w2"].astype(jnp.float32)
    h = jnp.maximum(x_bf @ w1 + params["b1"], 0.0)
    h_bf = h.astype(jnp.bfloat16).astype(jnp.float32)
    logits = h_bf @ w2 + params["b2"]
    return jax.nn.softmax(logits, axis=1)


# ----------------------------------------------------------------------------
# Deterministic parameter init (weights stored in bf16; biases in f32).
# ----------------------------------------------------------------------------

def init_params(key, dim_in, dim_hidden, dim_out):
    k1, k2, k3, k4 = jax.random.split(key, 4)
    w1 = (jax.random.normal(k1, (dim_in, dim_hidden), jnp.float32)
          / jnp.sqrt(float(dim_in))).astype(jnp.bfloat16)
    b1 = jax.random.normal(k2, (1, dim_hidden), jnp.float32) * 0.1
    w2 = (jax.random.normal(k3, (dim_hidden, dim_out), jnp.float32)
          / jnp.sqrt(float(dim_hidden))).astype(jnp.bfloat16)
    b2 = jax.random.normal(k4, (1, dim_out), jnp.float32) * 0.1
    return {"w1": w1, "b1": b1, "w2": w2, "b2": b2}


# ----------------------------------------------------------------------------
# main
# ----------------------------------------------------------------------------

if __name__ == "__main__":
    key = jax.random.PRNGKey(0)
    k_params, k_input = jax.random.split(key)

    batch, C, H, W = 2, 4, 16, 16
    dim_in = C * H * W          # 1024
    dim_hidden = 128            # lane-dense hidden width
    dim_out = 10

    params = init_params(k_params, dim_in, dim_hidden, dim_out)
    x = jax.random.normal(k_input, (batch, C, H, W), jnp.float32)

    fwd = jax.jit(mlp_forward)
    out = jax.block_until_ready(fwd(params, x))

    assert out.shape == (batch, dim_out)
    assert bool(jnp.all(jnp.isfinite(out)))
    # softmax rows must sum to ~1
    assert bool(jnp.allclose(jnp.sum(out, axis=1), 1.0, atol=1e-4))
    # match pure-JAX reference
    ref = mlp_reference(params, x)
    assert bool(jnp.allclose(out, ref, atol=1e-3)), float(jnp.max(jnp.abs(out - ref)))

    print("KERNEL_OK")
</pallas_src>

<mosaic_0001>
module attributes {stable_mosaic.version = 11 : i64} {
  func.func @_mlp_kernel(%arg0: i32, %arg1: memref<8x1024xbf16, #tpu.memory_space<vmem>>, %arg2: memref<1024x128xbf16, #tpu.memory_space<vmem>>, %arg3: memref<1x128xf32, #tpu.memory_space<vmem>>, %arg4: memref<128x10xbf16, #tpu.memory_space<vmem>>, %arg5: memref<1x10xf32, #tpu.memory_space<vmem>>, %arg6: memref<8x10xf32, #tpu.memory_space<vmem>>) attributes {dimension_semantics = [#tpu.dimension_semantics<parallel>], iteration_bounds = array<i64: 1>, scalar_prefetch = 0 : i64, scratch_operands = 0 : i64, tpu.core_type = #tpu.core_type<tc>, window_params = [{transform_indices = @transform_0, window_bounds = array<i64: 8, 1024>}, {pipeline_mode = #tpu.pipeline_mode<synchronous>, transform_indices = @transform_1, window_bounds = array<i64: 1024, 128>}, {pipeline_mode = #tpu.pipeline_mode<synchronous>, transform_indices = @transform_2, window_bounds = array<i64: 1, 128>}, {pipeline_mode = #tpu.pipeline_mode<synchronous>, transform_indices = @transform_3, window_bounds = array<i64: 128, 10>}, {pipeline_mode = #tpu.pipeline_mode<synchronous>, transform_indices = @transform_4, window_bounds = array<i64: 1, 10>}, {transform_indices = @transform_5, window_bounds = array<i64: 8, 10>}]} {
    %c0 = arith.constant 0 : index
    %c0_0 = arith.constant 0 : index
    %0 = vector.load %arg1[%c0, %c0_0] : memref<8x1024xbf16, #tpu.memory_space<vmem>>, vector<8x1024xbf16>
    %c0_1 = arith.constant 0 : index
    %c0_2 = arith.constant 0 : index
    %1 = vector.load %arg2[%c0_1, %c0_2] : memref<1024x128xbf16, #tpu.memory_space<vmem>>, vector<1024x128xbf16>
    %cst = arith.constant dense<0.000000e+00> : vector<8x128xf32>
    %2 = tpu.matmul %0, %1, %cst {dimension_numbers = #tpu.dot_dimension_numbers<[1], [0], [0], [1], [0, 0, 1, 1], [], []>} : vector<8x1024xbf16>, vector<1024x128xbf16>, vector<8x128xf32> -> vector<8x128xf32>
    %c0_3 = arith.constant 0 : index
    %c0_4 = arith.constant 0 : index
    %3 = vector.load %arg3[%c0_3, %c0_4] : memref<1x128xf32, #tpu.memory_space<vmem>>, vector<1x128xf32>
    %4 = vector.broadcast %3 : vector<1x128xf32> to vector<8x128xf32>
    %5 = arith.addf %2, %4 : vector<8x128xf32>
    %cst_5 = arith.constant 0.000000e+00 : f32
    %6 = vector.broadcast %cst_5 : f32 to vector<8x128xf32>
    %7 = arith.maximumf %5, %6 : vector<8x128xf32>
    %8 = arith.truncf %7 : vector<8x128xf32> to vector<8x128xbf16>
    %c0_6 = arith.constant 0 : index
    %c0_7 = arith.constant 0 : index
    %9 = vector.load %arg4[%c0_6, %c0_7] : memref<128x10xbf16, #tpu.memory_space<vmem>>, vector<128x10xbf16>
    %cst_8 = arith.constant dense<0.000000e+00> : vector<8x10xf32>
    %10 = tpu.matmul %8, %9, %cst_8 {dimension_numbers = #tpu.dot_dimension_numbers<[1], [0], [0], [1], [0, 0, 1, 1], [], []>} : vector<8x128xbf16>, vector<128x10xbf16>, vector<8x10xf32> -> vector<8x10xf32>
    %c0_9 = arith.constant 0 : index
    %c0_10 = arith.constant 0 : index
    %11 = vector.load %arg5[%c0_9, %c0_10] : memref<1x10xf32, #tpu.memory_space<vmem>>, vector<1x10xf32>
    %12 = vector.broadcast %11 : vector<1x10xf32> to vector<8x10xf32>
    %13 = arith.addf %10, %12 : vector<8x10xf32>
    %cst_11 = arith.constant dense<0xFF800000> : vector<8xf32>
    %14 = vector.multi_reduction <maximumf>, %13, %cst_11 [1] : vector<8x10xf32> to vector<8xf32>
    %15 = vector.shape_cast %14 : vector<8xf32> to vector<8x1xf32>
    %16 = vector.broadcast %15 : vector<8x1xf32> to vector<8x10xf32>
    %17 = arith.subf %13, %16 : vector<8x10xf32>
    %18 = math.exp %17 : vector<8x10xf32>
    %cst_12 = arith.constant dense<0.000000e+00> : vector<8xf32>
    %19 = vector.multi_reduction <add>, %18, %cst_12 [1] : vector<8x10xf32> to vector<8xf32>
    %20 = vector.shape_cast %19 : vector<8xf32> to vector<8x1xf32>
    %21 = vector.broadcast %20 : vector<8x1xf32> to vector<8x10xf32>
    %22 = arith.divf %18, %21 : vector<8x10xf32>
    %c0_13 = arith.constant 0 : index
    %c0_14 = arith.constant 0 : index
    %23 = vector.load %arg6[%c0_13, %c0_14] : memref<8x10xf32, #tpu.memory_space<vmem>>, vector<8x10xf32>
    tpu.vector_store %arg6[%c0_13, %c0_14], %22 {strides = array<i32>} : memref<8x10xf32, #tpu.memory_space<vmem>>, vector<8x10xf32>,
    return
  }
  func.func @transform_0(%arg0: i32) -> (i32, i32) {
    %c0_i32 = arith.constant 0 : i32
    %c0_i32_0 = arith.constant 0 : i32
    return %arg0, %c0_i32 : i32, i32
  }
  func.func @transform_1(%arg0: i32) -> (i32, i32) {
    %c0_i32 = arith.constant 0 : i32
    %c0_i32_0 = arith.constant 0 : i32
    %c0_i32_1 = arith.constant 0 : i32
    return %c0_i32, %c0_i32_0 : i32, i32
  }
  func.func @transform_2(%arg0: i32) -> (i32, i32) {
    %c0_i32 = arith.constant 0 : i32
    %c0_i32_0 = arith.constant 0 : i32
    %c0_i32_1 = arith.constant 0 : i32
    return %c0_i32, %c0_i32_0 : i32, i32
  }
  func.func @transform_3(%arg0: i32) -> (i32, i32) {
    %c0_i32 = arith.constant 0 : i32
    %c0_i32_0 = arith.constant 0 : i32
    %c0_i32_1 = arith.constant 0 : i32
    return %c0_i32, %c0_i32_0 : i32, i32
  }
  func.func @transform_4(%arg0: i32) -> (i32, i32) {
    %c0_i32 = arith.constant 0 : i32
    %c0_i32_0 = arith.constant 0 : i32
    %c0_i32_1 = arith.constant 0 : i32
    return %c0_i32, %c0_i32_0 : i32, i32
  }
  func.func @transform_5(%arg0: i32) -> (i32, i32) {
    %c0_i32 = arith.constant 0 : i32
    %c0_i32_0 = arith.constant 0 : i32
    return %arg0, %c0_i32 : i32, i32
  }
}

</mosaic_0001>

<bundles_post_ra>
// kernel: mlp_forward.1
= control target key start
LH: loop header
LB: loop body
LE: loop exit
PB: predicated region body
PF: predicated region fallthrough
CT: control target
= control target key end

     0   :  { %10 = vsyncpa [#allocation3], 0  ;;  %s1189_s18 = smov [#allocation2]   ;;  %s1284_s0 = inlined_call_operand.vmem [shape: bf16[8,1024], index: 0, kind: input, shape index: {}]   ;;  %s1285_s1 = inlined_call_operand.hbm [shape: bf16[1024,128], index: 1, kind: input, shape index: {}]   ;;  %s1286_s2 = inlined_call_operand.vmem [shape: f32[1,128], index: 2, kind: input, shape index: {}]   ;;  %s1287_s3 = inlined_call_operand.vmem [shape: bf16[128,10], index: 3, kind: input, shape index: {}]   ;;  %s1288_s4 = inlined_call_operand.vmem [shape: f32[1,10], index: 4, kind: input, shape index: {}]   ;;  %s1289_s5 = inlined_call_operand.vmem [shape: f32[8,10], index: 5, kind: output, shape index: {}]  }
   0x1   :  { %s18_s19 = sshll.u32 %s1189_s18, 4  ;;  %s1165_s22 = scalar_lea.hbm %s1285_s1, 8192  ;;  %s19_s19 = int_to_ptr.vmem [resolvable:$true] %s18_s19 }
   0x2   :  { %p1166_p0 = scmp.ne.s32.totalorder %s1285_s1, %s1165_s22  ;;  %p1169_p1 = scmp.lt.u32.totalorder %s1165_s22, %s1285_s1 }
   0x4   :  { %p1171_p2 = pnand %p1169_p1, %p1166_p0 }
   0x6   :  { %1174 = shalt.err (!%p1171_p2)
}
   0x7   :  { %s1175_s27 = scalar_lea.vmem %s19_s19, 8192  ;;  %p1180_p4 = scmp.lt.s32.totalorder %s19_s19, %s19_s19 }
   0x8   :  { %p1176_p3 = scmp.ne.s32.totalorder %s19_s19, %s1175_s27  ;;  %p1181_p5 = scmp.lt.s32.totalorder %s1175_s27, %s1175_s27 }
   0xa   :  { %p1182_p6 = por %p1181_p5, %p1180_p4 }
   0xc   :  { %p1183_p7 = pnand %p1182_p6, %p1176_p3 }
   0xe   :  { %1186 = shalt.err (!%p1183_p7)
}
   0xf   :  { %s1190_s28 = smov 64   ;;  %s1191_s29 = smov 4  }
  0x10   :  { %24 = dma.hbm_to_vmem [thread:$0]  %s1285_s1, 8192, %s19_s19, [#allocation3], %s1190_s28, %s1190_s28, %s1191_s29  }
  0x11   :  { %1187 = dma.done.wait [#allocation3], 8192  }
  0x12   :  { %1188 = vsyncadd [#allocation3], 4294959104  ;;  %v1081_v0 = vld [vmem:[#allocation2 + $0x40] sm:$0xff]   ;;  %v1085_v4 = vld [vmem:[#allocation2 + $0x48] sm:$0xff]   ;;  %vm1193_vm0 = vmmov 0   ;;  %vm859_vm1 = vcmask 80896  }
  0x13   :  { %v1082_v1 = vld [vmem:[#allocation2 + $0xc0] sm:$0xff]   ;;  %959 = vmatprep.subr.bf16.mxu0 %v1081_v0  ;;  %v1086_v5 = vld [vmem:[#allocation2 + $0xc8] sm:$0xff]   ;;  %v1089_v8 = vld [vmem:[#allocation2 + $0x50] sm:$0xff]  }
  0x14   :  { %v1083_v2 = vld [vmem:[#allocation2] sm:$0xff]   ;;  %981 = vmatprep.subr.bf16.mxu1 %v1082_v1  ;;  %v1087_v6 = vld [vmem:[#allocation2 + $0x8] sm:$0xff]   ;;  %v1090_v9 = vld [vmem:[#allocation2 + $0xd0] sm:$0xff]  }
  0x15   :  { %v1084_v3 = vld [vmem:[#allocation2 + $0x80] sm:$0xff]   ;;  %960 = vmatpush3.bf16.msra.mxu0 %v1083_v2  ;;  %v1088_v7 = vld [vmem:[#allocation2 + $0x88] sm:$0xff]   ;;  %v1091_v10 = vld [vmem:[#allocation2 + $0x10] sm:$0xff]  }
  0x16   :  { %982 = vmatpush3.bf16.msra.mxu1 %v1084_v3  ;;  %961 = vmatprep.subr.bf16.mxu0 %v1085_v4  ;;  %v1092_v11 = vld [vmem:[#allocation2 + $0x90] sm:$0xff]   ;;  %v1093_v12 = vld [vmem:[#allocation2 + $0x58] sm:$0xff]   ;;  %v1097_v16 = vld [vmem:[#allocation2 + $0x60] sm:$0xff]  }
  0x17   :  { %983 = vmatprep.subr.bf16.mxu1 %v1086_v5  ;;  %v1094_v13 = vld [vmem:[#allocation2 + $0xd8] sm:$0xff]   ;;  %v1098_v17 = vld [vmem:[#allocation2 + $0xe0] sm:$0xff]   ;;  %v1101_v20 = vld [vmem:[#allocation2 + $0x68] sm:$0xff]  }
  0x18   :  { %v1095_v14 = vld [vmem:[#allocation2 + $0x18] sm:$0xff]   ;;  %v1099_v18 = vld [vmem:[#allocation2 + $0x20] sm:$0xff]   ;;  %v1102_v21 = vld [vmem:[#allocation2 + $0xe8] sm:$0xff]  }
  0x19   :  { %962 = vmatpush3.bf16.msra.mxu0 %v1087_v6  ;;  %v1096_v15 = vld [vmem:[#allocation2 + $0x98] sm:$0xff]   ;;  %v1100_v19 = vld [vmem:[#allocation2 + $0xa0] sm:$0xff]   ;;  %v1103_v22 = vld [vmem:[#allocation2 + $0x28] sm:$0xff]  }
  0x1a   :  { %984 = vmatpush3.bf16.msra.mxu1 %v1088_v7  ;;  %963 = vmatprep.subr.bf16.mxu0 %v1089_v8  ;;  %v1104_v23 = vld [vmem:[#allocation2 + $0xa8] sm:$0xff]   ;;  %v1105_v24 = vld [vmem:[#allocation2 + $0x70] sm:$0xff]   ;;  %v1109_v28 = vld [vmem:[#allocation2 + $0x78] sm:$0xff]  }
  0x1b   :  { %985 = vmatprep.subr.bf16.mxu1 %v1090_v9  ;;  %v1106_v25 = vld [vmem:[#allocation2 + $0xf0] sm:$0xff]   ;;  %v1110_v29 = vld [vmem:[#allocation2 + $0xf8] sm:$0xff]   ;;  %v35_v32 = vld [vmem:[%s1284_s0] sm:$0xff] }
  0x1c   :  { %v1107_v26 = vld [vmem:[#allocation2 + $0x30] sm:$0xff]   ;;  %v1111_v30 = vld [vmem:[#allocation2 + $0x38] sm:$0xff]   ;;  %v36_v33 = vld [vmem:[%s1284_s0 + $0x8] sm:$0xff]  ;;  %v878_v34 = vcombine.low %v35_v32, %v35_v32  ;;  %v879_v35 = vcombine.high %v35_v32, %v35_v32 }
  0x1d   :  { %964 = vmatpush3.bf16.msra.mxu0 %v1091_v10  ;;  %v1108_v27 = vld [vmem:[#allocation2 + $0xb0] sm:$0xff]   ;;  %v1112_v31 = vld [vmem:[#allocation2 + $0xb8] sm:$0xff]   ;;  %v880_v36 = vcombine.low %v36_v33, %v36_v33  ;;  %v881_v37 = vcombine.high %v36_v33, %v36_v33  ;;  %v1117_v38 = vld [vmem:[#allocation2 + $0x140] sm:$0xff]  }
  0x1e   :  { %986 = vmatpush3.bf16.msra.mxu1 %v1092_v11  ;;  %965 = vmatprep.subr.bf16.mxu0 %v1093_v12  ;;  %v1118_v39 = vld [vmem:[#allocation2 + $0x1c0] sm:$0xff]   ;;  %v1121_v42 = vld [vmem:[#allocation2 + $0x148] sm:$0xff]   ;;  %v1125_v46 = vld [vmem:[#allocation2 + $0x150] sm:$0xff]  }
  0x1f   :  { %987 = vmatprep.subr.bf16.mxu1 %v1094_v13  ;;  %618 = vmatprep.mubr.bf16.mxu0 %v879_v35  ;;  %v1119_v40 = vld [vmem:[#allocation2 + $0x100] sm:$0xff]   ;;  %v1122_v43 = vld [vmem:[#allocation2 + $0x1c8] sm:$0xff]   ;;  %v1126_v47 = vld [vmem:[#allocation2 + $0x1d0] sm:$0xff]   ;;  %v1192_v13 = vmov 0.0  }
  0x20   :  { %658 = vmatprep.mubr.bf16.mxu1 %v881_v37  ;;  %v1120_v41 = vld [vmem:[#allocation2 + $0x180] sm:$0xff]   ;;  %v1123_v44 = vld [vmem:[#allocation2 + $0x108] sm:$0xff]   ;;  %v1127_v48 = vld [vmem:[#allocation2 + $0x110] sm:$0xff]  }
  0x21   :  { %966 = vmatpush3.bf16.msra.mxu0 %v1095_v14  ;;  %v1124_v45 = vld [vmem:[#allocation2 + $0x188] sm:$0xff]   ;;  %v1128_v49 = vld [vmem:[#allocation2 + $0x190] sm:$0xff]   ;;  %v1129_v50 = vld [vmem:[#allocation2 + $0x158] sm:$0xff]  }
  0x22   :  { %988 = vmatpush3.bf16.msra.mxu1 %v1096_v15  ;;  %967 = vmatprep.subr.bf16.mxu0 %v1097_v16  ;;  %v1130_v51 = vld [vmem:[#allocation2 + $0x1d8] sm:$0xff]   ;;  %v1133_v54 = vld [vmem:[#allocation2 + $0x160] sm:$0xff]   ;;  %v1137_v58 = vld [vmem:[#allocation2 + $0x168] sm:$0xff]  }
  0x23   :  { %989 = vmatprep.subr.bf16.mxu1 %v1098_v17  ;;  %v1131_v52 = vld [vmem:[#allocation2 + $0x118] sm:$0xff]   ;;  %v1134_v55 = vld [vmem:[#allocation2 + $0x1e0] sm:$0xff]   ;;  %v1138_v59 = vld [vmem:[#allocation2 + $0x1e8] sm:$0xff]  }
  0x24   :  { %v1132_v53 = vld [vmem:[#allocation2 + $0x198] sm:$0xff]   ;;  %v1135_v56 = vld [vmem:[#allocation2 + $0x120] sm:$0xff]   ;;  %v1139_v60 = vld [vmem:[#allocation2 + $0x128] sm:$0xff]  }
  0x25   :  { %968 = vmatpush3.bf16.msra.mxu0 %v1099_v18  ;;  %v1136_v57 = vld [vmem:[#allocation2 + $0x1a0] sm:$0xff]   ;;  %v1140_v61 = vld [vmem:[#allocation2 + $0x1a8] sm:$0xff]   ;;  %v1141_v62 = vld [vmem:[#allocation2 + $0x170] sm:$0xff]  }
  0x26   :  { %990 = vmatpush3.bf16.msra.mxu1 %v1100_v19  ;;  %969 = vmatprep.subr.bf16.mxu0 %v1101_v20  ;;  %v1142_v63 = vld [vmem:[#allocation2 + $0x1f0] sm:$0xff]   ;;  %v1145_v2 = vld [vmem:[#allocation2 + $0x178] sm:$0xff]   ;;  %v1153_v12 = vld [vmem:[%s1287_s3] sm:$0xff]  }
  0x27   :  { %991 = vmatprep.subr.bf16.mxu1 %v1102_v21  ;;  %v1143_v0 = vld [vmem:[#allocation2 + $0x130] sm:$0xff]   ;;  %v1146_v3 = vld [vmem:[#allocation2 + $0x1f8] sm:$0xff]   ;;  %v1154_v14 = vld [vmem:[%s1287_s3 + $0x8] sm:$0xff]  }
  0x28   :  { %v1144_v1 = vld [vmem:[#allocation2 + $0x1b0] sm:$0xff]   ;;  %v1147_v4 = vld [vmem:[#allocation2 + $0x138] sm:$0xff]   ;;  %v1157_v17 = vld [vmem:[%s1287_s3 + $0x20] sm:$0xff]  }
  0x29   :  { %970 = vmatpush3.bf16.msra.mxu0 %v1103_v22  ;;  %v1148_v5 = vld [vmem:[#allocation2 + $0x1b8] sm:$0xff]   ;;  %v37_v6 = vld [vmem:[%s1284_s0 + $0x10] sm:$0xff]  ;;  %v1158_v18 = vld [vmem:[%s1287_s3 + $0x28] sm:$0xff]  }
  0x2a   :  { %992 = vmatpush3.bf16.msra.mxu1 %v1104_v23  ;;  %971 = vmatprep.subr.bf16.mxu0 %v1105_v24  ;;  %v882_v7 = vcombine.low %v37_v6, %v37_v6  ;;  %v883_v8 = vcombine.high %v37_v6, %v37_v6  ;;  %v38_v9 = vld [vmem:[%s1284_s0 + $0x18] sm:$0xff]  ;;  %v1155_v15 = vld [vmem:[%s1287_s3 + $0x10] sm:$0xff]   ;;  %v877_v23 = vld [vmem:[%s1286_s2] ss:$0 sm:$0xff] }
  0x2b   :  { %993 = vmatprep.subr.bf16.mxu1 %v1106_v25  ;;  %v884_v10 = vcombine.low %v38_v9, %v38_v9  ;;  %v885_v11 = vcombine.high %v38_v9, %v38_v9  ;;  %v1156_v16 = vld [vmem:[%s1287_s3 + $0x18] sm:$0xff]   ;;  %v1159_v19 = vld [vmem:[%s1287_s3 + $0x30] sm:$0xff]  }
  0x2c   :  { %v1160_v20 = vld [vmem:[%s1287_s3 + $0x38] sm:$0xff]  }
  0x2d   :  { %972 = vmatpush3.bf16.msra.mxu0 %v1107_v26 }
  0x2e   :  { %994 = vmatpush3.bf16.msra.mxu1 %v1108_v27  ;;  %973 = vmatprep.subr.bf16.mxu0 %v1109_v28 }
  0x2f   :  { %995 = vmatprep.subr.bf16.mxu1 %v1110_v29 }
  0x31   :  { %974 = vmatpush3.bf16.msra.mxu0 %v1111_v30 }
  0x32   :  { %996 = vmatpush3.bf16.msra.mxu1 %v1112_v31  ;;  %1003 = vmatprep.subr.bf16.mxu0 %v1117_v38 }
  0x33   :  { %1025 = vmatprep.subr.bf16.mxu1 %v1118_v39 }
  0x34   :  { %619 = vmatmul.mubr.bf16.vlgmr.msra.gmra.mrb[0].mxu0 %v878_v34 }
  0x35   :  { %659 = vmatmul.mubr.bf16.vlgmr.msra.gmra.mrb[0].mxu1 %v880_v36  ;;  %1004 = vmatpush3.bf16.msra.mxu0 %v1119_v40 }
  0x36   :  { %1026 = vmatpush3.bf16.msra.mxu1 %v1120_v41  ;;  %1005 = vmatprep.subr.bf16.mxu0 %v1121_v42 }
  0x37   :  { %1027 = vmatprep.subr.bf16.mxu1 %v1122_v43  ;;  %698 = vmatprep.mubr.bf16.mxu0 %v883_v8 }
  0x38   :  { %738 = vmatprep.mubr.bf16.mxu1 %v885_v11 }
  0x39   :  { %1006 = vmatpush3.bf16.msra.mxu0 %v1123_v44 }
  0x3a   :  { %1028 = vmatpush3.bf16.msra.mxu1 %v1124_v45  ;;  %1007 = vmatprep.subr.bf16.mxu0 %v1125_v46 }
  0x3b   :  { %1029 = vmatprep.subr.bf16.mxu1 %v1126_v47 }
  0x3d   :  { %1008 = vmatpush3.bf16.msra.mxu0 %v1127_v48  ;;  %v950_v48 = vld [vmem:[%s1288_s4] ss:$0 sm:$0xff] }
  0x3e   :  { %1030 = vmatpush3.bf16.msra.mxu1 %v1128_v49  ;;  %1009 = vmatprep.subr.bf16.mxu0 %v1129_v50 }
  0x3f   :  { %1031 = vmatprep.subr.bf16.mxu1 %v1130_v51 }
  0x41   :  { %1010 = vmatpush3.bf16.msra.mxu0 %v1131_v52 }
  0x42   :  { %1032 = vmatpush3.bf16.msra.mxu1 %v1132_v53  ;;  %1011 = vmatprep.subr.bf16.mxu0 %v1133_v54 }
  0x43   :  { %1033 = vmatprep.subr.bf16.mxu1 %v1134_v55 }
  0x45   :  { %1012 = vmatpush3.bf16.msra.mxu0 %v1135_v56 }
  0x46   :  { %1034 = vmatpush3.bf16.msra.mxu1 %v1136_v57  ;;  %1013 = vmatprep.subr.bf16.mxu0 %v1137_v58 }
  0x47   :  { %1035 = vmatprep.subr.bf16.mxu1 %v1138_v59 }
  0x49   :  { %1014 = vmatpush3.bf16.msra.mxu0 %v1139_v60 }
  0x4a   :  { %1036 = vmatpush3.bf16.msra.mxu1 %v1140_v61  ;;  %1015 = vmatprep.subr.bf16.mxu0 %v1141_v62 }
  0x4b   :  { %1037 = vmatprep.subr.bf16.mxu1 %v1142_v63 }
  0x4d   :  { %1016 = vmatpush3.bf16.msra.mxu0 %v1143_v0 }
  0x4e   :  { %1038 = vmatpush3.bf16.msra.mxu1 %v1144_v1  ;;  %1017 = vmatprep.subr.bf16.mxu0 %v1145_v2 }
  0x4f   :  { %1039 = vmatprep.subr.bf16.mxu1 %v1146_v3 }
  0x51   :  { %1018 = vmatpush3.bf16.msra.mxu0 %v1147_v4 }
  0x52   :  { %1040 = vmatpush3.bf16.msra.mxu1 %v1148_v5  ;;  %1056 = vmatprep.subr.bf16.mxu0 %v1192_v13 }
  0x54   :  { %699 = vmatmul.mubr.bf16.vlgmr.msra.gmra.mrb[4].mxu0 %v882_v7 }
  0x55   :  { %739 = vmatmul.mubr.bf16.vlgmr.msra.gmra.mrb[4].mxu1 %v884_v10  ;;  %1057 = vmatpush3.bf16.msra.mxu0 %v1153_v12 }
  0x56   :  { %1058 = vmatprep.subr.bf16.mxu0 %v1192_v13  ;;  %1072 = vmatprep.mubr.msk.bf16.mxu0 %vm1193_vm0, %v1192_v13 }
  0x59   :  { %1059 = vmatpush3.bf16.msra.mxu0 %v1154_v14 }
  0x5a   :  { %1060 = vmatprep.subr.bf16.mxu0 %v1192_v13 }
  0x5d   :  { %1061 = vmatpush3.bf16.msra.mxu0 %v1155_v15 }
  0x5e   :  { %1062 = vmatprep.subr.bf16.mxu0 %v1192_v13 }
  0x61   :  { %1063 = vmatpush3.bf16.msra.mxu0 %v1156_v16 }
  0x62   :  { %1064 = vmatprep.subr.bf16.mxu0 %v1192_v13 }
  0x65   :  { %1065 = vmatpush3.bf16.msra.mxu0 %v1157_v17 }
  0x66   :  { %1066 = vmatprep.subr.bf16.mxu0 %v1192_v13 }
  0x69   :  { %1067 = vmatpush3.bf16.msra.mxu0 %v1158_v18 }
  0x6a   :  { %1068 = vmatprep.subr.bf16.mxu0 %v1192_v13 }
  0x6d   :  { %1069 = vmatpush3.bf16.msra.mxu0 %v1159_v19 }
  0x6e   :  { %1070 = vmatprep.subr.bf16.mxu0 %v1192_v13 }
  0x71   :  { %1071 = vmatpush3.bf16.msra.mxu0 %v1160_v20 }
 0x107   :  { %v975_v21 = vpop.f32.mrb[0].mxu0 }
 0x108   :  { %v997_v22 = vpop.f32.mrb[0].mxu1  ;;  %v976_v24 = vpop.f32.mrb[1].mxu0 }
 0x109   :  { %v998_v25 = vpop.f32.mrb[1].mxu1  ;;  %v977_v26 = vadd.f32 %v976_v24, %v975_v21  ;;  %v978_v28 = vpop.f32.mrb[2].mxu0 }
 0x10a   :  { %v999_v27 = vadd.f32 %v998_v25, %v997_v22  ;;  %v1000_v29 = vpop.f32.mrb[2].mxu1  ;;  %v979_v30 = vpop.f32.mrb[3].mxu0 }
 0x10b   :  { %v1001_v31 = vpop.f32.mrb[3].mxu1  ;;  %v621_v32 = vadd.f32 %v977_v26, %v877_v23 }
 0x10d   :  { %v661_v33 = vadd.f32 %v999_v27, %v621_v32 }
 0x127   :  { %v1019_v34 = vpop.f32.mrb[4].mxu0 }
 0x128   :  { %v1041_v35 = vpop.f32.mrb[4].mxu1  ;;  %v1020_v36 = vpop.f32.mrb[5].mxu0 }
 0x129   :  { %v1042_v37 = vpop.f32.mrb[5].mxu1  ;;  %v1021_v38 = vadd.f32 %v1020_v36, %v1019_v34  ;;  %v1022_v40 = vpop.f32.mrb[6].mxu0 }
 0x12a   :  { %v1043_v39 = vadd.f32 %v1042_v37, %v1041_v35  ;;  %v1044_v41 = vpop.f32.mrb[6].mxu1  ;;  %v1023_v42 = vpop.f32.mrb[7].mxu0 }
 0x12b   :  { %v1045_v43 = vpop.f32.mrb[7].mxu1  ;;  %v701_v44 = vadd.f32 %v1021_v38, %v661_v33 }
 0x12d   :  { %v741_v45 = vadd.f32 %v1043_v39, %v701_v44 }
 0x12f   :  { %v746_v46 = vmax.f32 %v741_v45, 0.0 }
 0x131   :  { %v747_v47 = vpack.c.bf16 %v746_v46, %v746_v46 }
 0x133   :  { %1073 = vmatmul.mubr.bf16.vlgmr.msra.gmra.mrb[8].mxu0 %v747_v47 }
 0x206   :  { %v853_v49 = vpop.f32.mrb[8].mxu0 }
 0x207   :  { %v854_v50 = vadd.f32 %v950_v48, %v853_v49  ;;  %v1074_v51 = vpop.f32.mrb[9].mxu0 }
 0x208   :  { %v856_v52 = vpop.f32.mrb[10].mxu0 }
 0x209   :  { %v1075_v53 = vpop.f32.mrb[11].mxu0  ;;  %v860_v54 = vsel %vm859_vm1, %v854_v50, -inf }
 0x20a   :  { %861 = vmax.xlane.f32.xlu0 %v860_v54 }
 0x297   :  { %v862_v55 = vpop.xlane.xlu0 %861 }
 0x298   :  { %v863_v56 = vsub.f32 %v854_v50, %v862_v55 }
 0x29a   :  { %v864_v57 = vmul.f32 1.442695, %v863_v56 }
 0x29c   :  { %1161 = vpow2.f32 %v864_v57 }
 0x2a6   :  { %v1162_v58 = vpop.eup %1161 }
 0x2a7   :  { %v866_v59 = vsel %vm859_vm1, %v1162_v58, 0.0 }
 0x2a8   :  { %867 = vadd.xlane.f32.xlu0 %v866_v59 }
 0x335   :  { %v868_v60 = vpop.xlane.xlu0 %867 }
 0x336   :  { %1163 = vrcp.f32 %v868_v60 }
 0x340   :  { %v1164_v61 = vpop.eup %1163 }
 0x341   :  { %v870_v62 = vmul.f32 %v1164_v61, %v1162_v58 }
 0x343   :  { %871 = vst.msk [vmem:[%s1289_s5] sm:$0xff] %vm859_vm1, %v870_v62 }
 0x344   :  { %876 = vsyncpa [#allocation3], 1 }

</bundles_post_ra>
